<compile_context>
chip_gen: v7x
topology: tpu7x:2x2x1
jax: 0.10.0
libtpu: 0.0.40
codegen_flags: <defaults>
</compile_context>

<pallas_src>
import jax
import jax.numpy as jnp
from jax import lax
from jax.experimental import pallas as pl
from jax.experimental.pallas import tpu as pltpu


def _tile(dim, target, aligns=(128, 16, 8)):
    """Largest divisor of `dim` that is <= `target` and a multiple of one of
    `aligns` (tried in order).  Falls back to the full dim (always legal)."""
    if dim <= target:
        return dim
    for a in aligns:
        hi = (target // a) * a
        for cand in range(hi, 0, -a):
            if dim % cand == 0:
                return cand
    return dim


def _vmem_limit(need_bytes):
    """VMEM limit sized to the actual footprint (2x + 8 MiB margin), capped at
    48 MiB so a small kernel never reserves most of v7x's 64 MiB VMEM."""
    return int(min(max(2 * need_bytes + (8 << 20), 16 << 20), 48 << 20))


# ----------------------------------------------------------------------------
# Conv1D (y = x @ W + b) as a tiled, pipelined Pallas matmul
# ----------------------------------------------------------------------------
def _linear_kernel(x_ref, w_ref, b_ref, o_ref, acc_ref):
    k = pl.program_id(2)

    @pl.when(k == 0)
    def _():
        acc_ref[...] = jnp.zeros_like(acc_ref)

    acc_ref[...] += jnp.dot(x_ref[...], w_ref[...],
                            preferred_element_type=jnp.float32)

    @pl.when(k == pl.num_programs(2) - 1)
    def _():
        # Bias added once, in f32, at writeback.
        o_ref[...] = (acc_ref[...] + b_ref[...]).astype(o_ref.dtype)


def conv1d(x, w, b, *, compute_dtype=jnp.float32, out_dtype=jnp.float32,
           tm=512, tn=512, tk=512):
    """GPT-2 Conv1D. x: [M, K], w: [K, N], b: [N] -> [M, N] (out_dtype)."""
    M, K = x.shape
    N = w.shape[1]
    x = x.astype(compute_dtype)
    w = w.astype(compute_dtype)
    b2 = b.reshape(1, N).astype(jnp.float32)

    tm = _tile(M, tm)
    tn = _tile(N, tn)
    tk = _tile(K, tk)
    grid = (M // tm, N // tn, K // tk)

    it_c = jnp.dtype(compute_dtype).itemsize
    it_o = jnp.dtype(out_dtype).itemsize
    need = (2 * (tm * tk + tk * tn) * it_c + 2 * tn * 4
            + 2 * tm * tn * it_o + tm * tn * 4)

    cost = pl.CostEstimate(
        flops=2 * M * N * K,
        transcendentals=0,
        bytes_accessed=it_c * (M * K + K * N) + it_o * M * N + 4 * N,
    )

    return pl.pallas_call(
        _linear_kernel,
        out_shape=jax.ShapeDtypeStruct((M, N), out_dtype),
        grid=grid,
        in_specs=[
            pl.BlockSpec((tm, tk), lambda i, j, k: (i, k)),
            pl.BlockSpec((tk, tn), lambda i, j, k: (k, j)),
            pl.BlockSpec((1, tn), lambda i, j, k: (0, j)),
        ],
        out_specs=pl.BlockSpec((tm, tn), lambda i, j, k: (i, j)),
        scratch_shapes=[pltpu.VMEM((tm, tn), jnp.float32)],
        compiler_params=pltpu.CompilerParams(
            dimension_semantics=("parallel", "parallel", "arbitrary"),
            vmem_limit_bytes=_vmem_limit(need),
        ),
        cost_estimate=cost,
    )(x, w, b2)


# ----------------------------------------------------------------------------
# Flash-style causal multi-head self attention (heads handled inside kernel)
# ----------------------------------------------------------------------------
def _make_attn_kernel(*, n_head, d_head, tq, tk, scale, masked_bias):
    inv = 1.0 / float(d_head) ** 0.5

    def kernel(q_ref, k_ref, v_ref, o_ref, qs_sc, m_sc, l_sc, acc_sc):
        qi = pl.program_id(1)
        ki = pl.program_id(2)

        q_lo = qi * tq            # first query row of this q tile
        q_hi = q_lo + (tq - 1)    # last  query row
        k_lo = ki * tk            # first key column of this kv tile
        k_hi = k_lo + (tk - 1)    # last  key column

        @pl.when(ki == 0)
        def _():
            q = q_ref[0]
            if scale:
                q = q * inv       # fold 1/sqrt(Dh) into q once per q tile
            qs_sc[...] = q
            m_sc[...] = jnp.full_like(m_sc, -jnp.inf)
            l_sc[...] = jnp.zeros_like(l_sc)
            acc_sc[...] = jnp.zeros_like(acc_sc)

        # Any (row >= col) pair in this block?  Otherwise it is fully masked.
        compute_active = k_lo <= q_hi
        # Any (row < col) pair in this block?   Otherwise no mask is needed.
        has_masked = q_lo < k_hi

        def process(apply_mask):
            qv = qs_sc[...]        # [tq, H*Dh], already scaled
            kv = k_ref[0]          # [tk, H*Dh]
            vv = v_ref[0]          # [tk, H*Dh]
            if apply_mask:
                row = q_lo + lax.broadcasted_iota(jnp.int32, (tq, tk), 0)
                col = k_lo + lax.broadcasted_iota(jnp.int32, (tq, tk), 1)
                keep = row >= col  # shared across all heads
            for h in range(n_head):
                lo, hi = h * d_head, (h + 1) * d_head
                q_h = qv[:, lo:hi]
                k_h = kv[:, lo:hi]
                v_h = vv[:, lo:hi]
                # q_h @ k_h^T: contract Dh directly (no explicit transpose).
                s = lax.dot_general(q_h, k_h, (((1,), (1,)), ((), ())),
                                    preferred_element_type=jnp.float32)
                if apply_mask:
                    # torch semantics: masked positions -> exactly -10000.0
                    s = jnp.where(keep, s, jnp.float32(masked_bias))
                m_prev = m_sc[h]
                m_new = jnp.maximum(m_prev, jnp.max(s, axis=-1, keepdims=True))
                alpha = jnp.exp(m_prev - m_new)
                p = jnp.exp(s - m_new)
                l_sc[h] = alpha * l_sc[h] + jnp.sum(p, axis=-1, keepdims=True)
                acc_sc[h] = alpha * acc_sc[h] + jnp.dot(
                    p.astype(v_h.dtype), v_h,
                    preferred_element_type=jnp.float32)
                m_sc[h] = m_new

        @pl.when(compute_active & jnp.logical_not(has_masked))
        def _():
            process(apply_mask=False)      # interior (fully-unmasked) block

        @pl.when(compute_active & has_masked)
        def _():
            process(apply_mask=True)       # diagonal-straddling block

        @pl.when(ki == pl.num_programs(2) - 1)
        def _():
            for h in range(n_head):
                lo, hi = h * d_head, (h + 1) * d_head
                o_ref[0, :, lo:hi] = (
                    acc_sc[h] * pl.reciprocal(l_sc[h], approx=True)
                ).astype(o_ref.dtype)

    return kernel


def causal_self_attention(qkv, n_head, *, scale=False, masked_bias=-10000.0,
                          out_dtype=None, q_tile=128, kv_tile=256):
    """Causal multi-head self attention.

    qkv: [B, T, 3*nx] (c_attn output, features ordered [q | k | v], heads laid
    out head-major inside each nx-wide section).  Returns the merged context in
    [B, T, nx] layout, ready for c_proj with no head transpose.
    """
    B, T, three_nx = qkv.shape
    nx = three_nx // 3
    assert nx * 3 == three_nx and nx % n_head == 0
    d_head = nx // n_head
    dtype = qkv.dtype
    out_dtype = dtype if out_dtype is None else out_dtype

    sub_align = 16 if dtype == jnp.bfloat16 else 8
    tq = _tile(T, q_tile, aligns=(128, sub_align))
    tk = _tile(T, kv_tile, aligns=(128, sub_align))
    n_q, n_kv = T // tq, T // tk
    grid = (B, n_q, n_kv)

    def q_index_map(feat):
        return lambda b, qi, ki, _f=feat: (b, qi, _f)

    def kv_index_map(feat):
        def index_map(b, qi, ki, _f=feat):
            # Clamp fully-masked (above-diagonal) KV blocks to the last useful
            # block so the pipeline re-uses it and skips the HBM DMA.
            last_needed = ((qi + 1) * tq - 1) // tk
            return (b, jnp.minimum(ki, last_needed), _f)
        return index_map

    if nx % 128 == 0:
        # Lane-aligned head sections: read q/k/v straight out of the fused qkv
        # buffer (zero wrapper-side copies).
        operands = (qkv, qkv, qkv)
        feats = (0, 1, 2)
    else:
        # Fallback for tiny / unaligned nx: one cheap contiguous split.
        operands = tuple(jnp.split(qkv, 3, axis=-1))
        feats = (0, 0, 0)

    in_specs = [
        pl.BlockSpec((1, tq, nx), q_index_map(feats[0])),
        pl.BlockSpec((1, tk, nx), kv_index_map(feats[1])),
        pl.BlockSpec((1, tk, nx), kv_index_map(feats[2])),
    ]
    out_spec = pl.BlockSpec((1, tq, nx), lambda b, qi, ki: (b, qi, 0))

    it_in = jnp.dtype(dtype).itemsize
    it_out = jnp.dtype(out_dtype).itemsize
    need = (2 * (tq * nx + 2 * tk * nx) * it_in + 2 * tq * nx * it_out
            + tq * nx * it_in
            + n_head * tq * (2 * 128 + max(d_head, 128)) * 4)

    cost = pl.CostEstimate(
        flops=4 * B * n_head * T * T * d_head,   # QK^T + PV upper bound
        transcendentals=B * n_head * T * T,      # exp
        bytes_accessed=it_in * B * T * nx * (1 + n_q) + it_out * B * T * nx,
    )

    kernel = _make_attn_kernel(n_head=n_head, d_head=d_head, tq=tq, tk=tk,
                               scale=scale, masked_bias=float(masked_bias))

    return pl.pallas_call(
        kernel,
        out_shape=jax.ShapeDtypeStruct((B, T, nx), out_dtype),
        grid=grid,
        in_specs=in_specs,
        out_specs=out_spec,
        scratch_shapes=[
            pltpu.VMEM((tq, nx), dtype),                    # scaled q tile
            pltpu.VMEM((n_head, tq, 1), jnp.float32),       # running max m
            pltpu.VMEM((n_head, tq, 1), jnp.float32),       # running sum l
            pltpu.VMEM((n_head, tq, d_head), jnp.float32),  # running numerator
        ],
        compiler_params=pltpu.CompilerParams(
            dimension_semantics=("parallel", "parallel", "arbitrary"),
            vmem_limit_bytes=_vmem_limit(need),
        ),
        cost_estimate=cost,
    )(*operands)


# ----------------------------------------------------------------------------
# Attention module forward (self-attention path)
# ----------------------------------------------------------------------------
def attention_forward(hidden_states, params, n_head, scale=False,
                      compute_dtype=jnp.float32, q_tile=128, kv_tile=256):
    """Replicates Attention.forward(hidden_states) with layer_past=None,
    attention_mask=None, head_mask=None, use_cache=False, eval-mode dropout."""
    B, T, nx = hidden_states.shape
    x2 = hidden_states.reshape(B * T, nx)

    # c_attn: [B*T, nx] @ [nx, 3*nx] + b  (stored in compute dtype so the
    # attention kernel consumes it directly; no wrapper-side casts/transposes).
    qkv = conv1d(x2, params["c_attn_w"], params["c_attn_b"],
                 compute_dtype=compute_dtype, out_dtype=compute_dtype)
    qkv = qkv.reshape(B, T, 3 * nx)

    # Causal MHA; output already in merged [B, T, nx] layout.
    ctx = causal_self_attention(qkv, n_head, scale=scale,
                                out_dtype=compute_dtype,
                                q_tile=q_tile, kv_tile=kv_tile)

    # c_proj
    out = conv1d(ctx.reshape(B * T, nx), params["c_proj_w"],
                 params["c_proj_b"], compute_dtype=compute_dtype,
                 out_dtype=jnp.float32)
    return out.reshape(B, T, nx)


# ----------------------------------------------------------------------------
# Pure-JAX reference for verification
# ----------------------------------------------------------------------------
def attention_reference(hidden_states, params, n_head, scale=False):
    B, T, nx = hidden_states.shape
    Dh = nx // n_head
    qkv = hidden_states @ params["c_attn_w"] + params["c_attn_b"]
    q, k, v = jnp.split(qkv, 3, axis=-1)
    sh = lambda x: x.reshape(B, T, n_head, Dh).transpose(0, 2, 1, 3)
    q, k, v = sh(q), sh(k), sh(v)
    w = jnp.einsum("bhqd,bhkd->bhqk", q, k)
    if scale:
        w = w / jnp.float32(Dh) ** 0.5
    mask = jnp.tril(jnp.ones((T, T), dtype=bool))
    w = jnp.where(mask[None, None], w, jnp.float32(-10000.0))
    p = jax.nn.softmax(w, axis=-1)
    a = jnp.einsum("bhqk,bhkd->bhqd", p, v)
    a = a.transpose(0, 2, 1, 3).reshape(B, T, nx)
    return a @ params["c_proj_w"] + params["c_proj_b"]


# ----------------------------------------------------------------------------
if __name__ == "__main__":
    root = jax.random.PRNGKey(0)

    def make_case(seed, B, T, nx):
        key = jax.random.fold_in(root, seed)
        k0, k1, k2, k3, k4 = jax.random.split(key, 5)
        params = {
            "c_attn_w": 0.02 * jax.random.normal(k0, (nx, 3 * nx), jnp.float32),
            "c_attn_b": 0.02 * jax.random.normal(k1, (3 * nx,), jnp.float32),
            "c_proj_w": 0.02 * jax.random.normal(k2, (nx, nx), jnp.float32),
            "c_proj_b": 0.02 * jax.random.normal(k3, (nx,), jnp.float32),
        }
        x = jax.random.normal(k4, (B, T, nx), jnp.float32)
        return params, x

    def check(name, out, ref, atol, rtol):
        out = jax.block_until_ready(out)
        assert out.shape == ref.shape, (name, out.shape, ref.shape)
        err = float(jnp.max(jnp.abs(out - ref)))
        assert jnp.allclose(out, ref, atol=atol, rtol=rtol), (
            f"{name}: mismatch vs reference (max abs err {err:.3e})")

    # Case 1: base module config (B=2, T=8, nx=32, n_head=4), f32.
    params, x = make_case(0, 2, 8, 32)
    ref = attention_reference(x, params, 4)
    check("f32", attention_forward(x, params, 4), ref, 1e-3, 1e-2)

    # Case 2: scaled attention (scale=True, 1/sqrt(Dh) folded into q).
    ref_s = attention_reference(x, params, 4, scale=True)
    check("f32-scaled", attention_forward(x, params, 4, scale=True),
          ref_s, 1e-3, 1e-2)

    # Case 3: bf16 MXU path (bf16 intermediates, f32 accumulate / softmax).
    check("bf16", attention_forward(x, params, 4, compute_dtype=jnp.bfloat16),
          ref, 1e-2, 5e-2)

    # Case 4: 128-lane-aligned nx -> fused-qkv BlockSpec path (no split).
    params4, x4 = make_case(1, 2, 8, 128)
    ref4 = attention_reference(x4, params4, 2)
    check("fused-qkv", attention_forward(x4, params4, 2), ref4, 1e-3, 1e-2)

    # Case 5: multi-block grid (T=32, tiny tiles) exercising interior /
    # straddling / skipped KV blocks and the DMA-clamped kv index_map.
    params5, x5 = make_case(2, 2, 32, 32)
    ref5 = attention_reference(x5, params5, 4)
    check("multiblock",
          attention_forward(x5, params5, 4, q_tile=8, kv_tile=16),
          ref5, 1e-3, 1e-2)

    print("KERNEL_OK")
</pallas_src>

<mosaic_0001>
module attributes {stable_mosaic.version = 11 : i64} {
  func.func @_linear_kernel(%arg0: i32, %arg1: i32, %arg2: i32, %arg3: memref<16x32xf32, #tpu.memory_space<vmem>>, %arg4: memref<32x96xf32, #tpu.memory_space<vmem>>, %arg5: memref<1x96xf32, #tpu.memory_space<vmem>>, %arg6: memref<16x96xf32, #tpu.memory_space<vmem>>, %arg7: memref<16x96xf32, #tpu.memory_space<vmem>>) attributes {dimension_semantics = [#tpu.dimension_semantics<parallel>, #tpu.dimension_semantics<parallel>, #tpu.dimension_semantics<arbitrary>], iteration_bounds = array<i64: 1, 1, 1>, scalar_prefetch = 0 : i64, scratch_operands = 1 : i64, tpu.core_type = #tpu.core_type<tc>, window_params = [{transform_indices = @transform_0, window_bounds = array<i64: 16, 32>}, {transform_indices = @transform_1, window_bounds = array<i64: 32, 96>}, {transform_indices = @transform_2, window_bounds = array<i64: 1, 96>}, {transform_indices = @transform_3, window_bounds = array<i64: 16, 96>}]} {
    %c0_i32 = arith.constant 0 : i32
    %0 = arith.cmpi eq, %arg2, %c0_i32 : i32
    %1 = arith.extui %0 : i1 to i32
    %c0_i32_0 = arith.constant 0 : i32
    %2 = arith.cmpi ne, %1, %c0_i32_0 : i32
    scf.if %2 {
      %cst_10 = arith.constant 0.000000e+00 : f32
      %12 = vector.broadcast %cst_10 : f32 to vector<16x96xf32>
      %c0_11 = arith.constant 0 : index
      %c0_12 = arith.constant 0 : index
      %13 = vector.load %arg7[%c0_11, %c0_12] : memref<16x96xf32, #tpu.memory_space<vmem>>, vector<16x96xf32>
      tpu.vector_store %arg7[%c0_11, %c0_12], %12 {strides = array<i32>} : memref<16x96xf32, #tpu.memory_space<vmem>>, vector<16x96xf32>,
    } else {
    }
    %c0 = arith.constant 0 : index
    %c0_1 = arith.constant 0 : index
    %3 = vector.load %arg7[%c0, %c0_1] : memref<16x96xf32, #tpu.memory_space<vmem>>, vector<16x96xf32>
    %c0_2 = arith.constant 0 : index
    %c0_3 = arith.constant 0 : index
    %4 = vector.load %arg3[%c0_2, %c0_3] : memref<16x32xf32, #tpu.memory_space<vmem>>, vector<16x32xf32>
    %c0_4 = arith.constant 0 : index
    %c0_5 = arith.constant 0 : index
    %5 = vector.load %arg4[%c0_4, %c0_5] : memref<32x96xf32, #tpu.memory_space<vmem>>, vector<32x96xf32>
    %cst = arith.constant dense<0.000000e+00> : vector<16x96xf32>
    %6 = tpu.matmul %4, %5, %cst {dimension_numbers = #tpu.dot_dimension_numbers<[1], [0], [0], [1], [0, 0, 1, 1], [], []>} : vector<16x32xf32>, vector<32x96xf32>, vector<16x96xf32> -> vector<16x96xf32>
    %7 = arith.addf %3, %6 : vector<16x96xf32>
    %c0_6 = arith.constant 0 : index
    %c0_7 = arith.constant 0 : index
    %8 = vector.load %arg7[%c0_6, %c0_7] : memref<16x96xf32, #tpu.memory_space<vmem>>, vector<16x96xf32>
    tpu.vector_store %arg7[%c0_6, %c0_7], %7 {strides = array<i32>} : memref<16x96xf32, #tpu.memory_space<vmem>>, vector<16x96xf32>,
    %c0_i32_8 = arith.constant 0 : i32
    %9 = arith.cmpi eq, %arg2, %c0_i32_8 : i32
    %10 = arith.extui %9 : i1 to i32
    %c0_i32_9 = arith.constant 0 : i32
    %11 = arith.cmpi ne, %10, %c0_i32_9 : i32
    scf.if %11 {
      %c0_10 = arith.constant 0 : index
      %c0_11 = arith.constant 0 : index
      %12 = vector.load %arg7[%c0_10, %c0_11] : memref<16x96xf32, #tpu.memory_space<vmem>>, vector<16x96xf32>
      %c0_12 = arith.constant 0 : index
      %c0_13 = arith.constant 0 : index
      %13 = vector.load %arg5[%c0_12, %c0_13] : memref<1x96xf32, #tpu.memory_space<vmem>>, vector<1x96xf32>
      %14 = vector.broadcast %13 : vector<1x96xf32> to vector<16x96xf32>
      %15 = arith.addf %12, %14 : vector<16x96xf32>
      %c0_14 = arith.constant 0 : index
      %c0_15 = arith.constant 0 : index
      %16 = vector.load %arg6[%c0_14, %c0_15] : memref<16x96xf32, #tpu.memory_space<vmem>>, vector<16x96xf32>
      tpu.vector_store %arg6[%c0_14, %c0_15], %15 {strides = array<i32>} : memref<16x96xf32, #tpu.memory_space<vmem>>, vector<16x96xf32>,
    } else {
    }
    return
  }
  func.func @transform_0(%arg0: i32, %arg1: i32, %arg2: i32) -> (i32, i32) {
    %c0_i32 = arith.constant 0 : i32
    return %arg0, %arg2 : i32, i32
  }
  func.func @transform_1(%arg0: i32, %arg1: i32, %arg2: i32) -> (i32, i32) {
    %c0_i32 = arith.constant 0 : i32
    return %arg2, %arg1 : i32, i32
  }
  func.func @transform_2(%arg0: i32, %arg1: i32, %arg2: i32) -> (i32, i32) {
    %c0_i32 = arith.constant 0 : i32
    %c0_i32_0 = arith.constant 0 : i32
    return %c0_i32, %arg1 : i32, i32
  }
  func.func @transform_3(%arg0: i32, %arg1: i32, %arg2: i32) -> (i32, i32) {
    %c0_i32 = arith.constant 0 : i32
    return %arg0, %arg1 : i32, i32
  }
}

</mosaic_0001>

<bundles_post_ra>
// kernel: tpu_custom_call.1
= control target key start
LH: loop header
LB: loop body
LE: loop exit
PB: predicated region body
PF: predicated region fallthrough
CT: control target
= control target key end

     0   :  { %8 = vsyncpa [#allocation4], 0  ;;  %s365_s0 = inlined_call_operand.hbm [shape: f32[16,32], index: 0, kind: input, shape index: {}]   ;;  %s366_s1 = inlined_call_operand.hbm [shape: f32[32,96], index: 1, kind: input, shape index: {}]   ;;  %s367_s2 = inlined_call_operand.vmem [shape: f32[1,96], index: 2, kind: input, shape index: {}]   ;;  %s368_s3 = inlined_call_operand.hbm [shape: f32[16,96], index: 3, kind: output, shape index: {}]  }
   0x1   :  { %9 = vsyncpa [#allocation7], 0 }
   0x2   :  { %10 = vsyncpa [#allocation5], 0  ;;  %s285_s12 = smov [#allocation3]   ;;  %s213_s16 = scalar_lea.hbm %s365_s0, 256 }
   0x3   :  { %s16_s13 = sshll.u32 %s285_s12, 4  ;;  %p214_p0 = scmp.ne.s32.totalorder %s365_s0, %s213_s16  ;;  %s17_s13 = int_to_ptr.vmem [resolvable:$true] %s16_s13 }
   0x4   :  { %p217_p1 = scmp.lt.u32.totalorder %s213_s16, %s365_s0 }
   0x6   :  { %p219_p2 = pnand %p217_p1, %p214_p0 }
   0x8   :  { %222 = shalt.err (!%p219_p2)
}
   0x9   :  { %s223_s21 = scalar_lea.vmem %s17_s13, 256  ;;  %p228_p4 = scmp.lt.s32.totalorder %s17_s13, %s17_s13 }
   0xa   :  { %p224_p3 = scmp.ne.s32.totalorder %s17_s13, %s223_s21  ;;  %p229_p5 = scmp.lt.s32.totalorder %s223_s21, %s223_s21 }
   0xc   :  { %p230_p6 = por %p229_p5, %p228_p4 }
   0xe   :  { %p231_p7 = pnand %p230_p6, %p224_p3 }
  0x10   :  { %234 = shalt.err (!%p231_p7)
}
  0x11   :  { %s286_s22 = smov 128   ;;  %s287_s23 = smov 8  }
  0x12   :  { %22 = dma.hbm_to_vmem [thread:$0]  %s365_s0, 256, %s17_s13, [#allocation4], %s286_s22, %s286_s22, %s287_s23  }
  0x13   :  { %s288_s26 = smov [#allocation6]   ;;  %s235_s30 = scalar_lea.hbm %s366_s1, 512 }
  0x14   :  { %s28_s27 = sshll.u32 %s288_s26, 4  ;;  %p236_p8 = scmp.ne.s32.totalorder %s366_s1, %s235_s30  ;;  %s29_s27 = int_to_ptr.vmem [resolvable:$true] %s28_s27 }
  0x15   :  { %p239_p9 = scmp.lt.u32.totalorder %s235_s30, %s366_s1 }
  0x17   :  { %p241_p10 = pnand %p239_p9, %p236_p8 }
  0x19   :  { %244 = shalt.err (!%p241_p10)
}
  0x1a   :  { %s245_s8 = scalar_lea.vmem %s29_s27, 512  ;;  %p250_p12 = scmp.lt.s32.totalorder %s29_s27, %s29_s27 }
  0x1b   :  { %p246_p11 = scmp.ne.s32.totalorder %s29_s27, %s245_s8  ;;  %p251_p13 = scmp.lt.s32.totalorder %s245_s8, %s245_s8 }
  0x1d   :  { %p252_p0 = por %p251_p13, %p250_p12 }
  0x1f   :  { %p253_p1 = pnand %p252_p0, %p246_p11 }
  0x21   :  { %256 = shalt.err (!%p253_p1)
}
  0x22   :  { %34 = dma.hbm_to_vmem [thread:$0]  %s366_s1, 512, %s29_s27, [#allocation7], %s286_s22, %s286_s22, %s287_s23  }
  0x23   :  { %279 = dma.done.wait [#allocation4], 256  }
  0x24   :  { %280 = vsyncadd [#allocation4], 4294967040 }
  0x25   :  { %281 = dma.done.wait [#allocation7], 512  }
  0x26   :  { %282 = vsyncadd [#allocation7], 4294966784  ;;  %vm47_vm0 = vcmask 785408   ;;  %v289_v0 = vmov 0.0   ;;  %vm58_vm1 = vcmask 261120   ;;  %v54_v1 = vld [vmem:[#allocation6] sm:$0xff] }
  0x27   :  { %49 = vst.msk [vmem:[#allocation2 + $0x8] sm:$0xff] %vm47_vm0, %v289_v0  ;;  %48 = vst.msk [vmem:[#allocation2] sm:$0xff] %vm47_vm0, %v289_v0  ;;  %v55_v2 = vld [vmem:[#allocation6 + $0x8] sm:$0xff]  ;;  %v56_v3 = vld [vmem:[#allocation6 + $0x10] sm:$0xff]  ;;  %s290_s11 = smov [#allocation8]  }
  0x28   :  { %v199_v4 = vpack.c.bf16 %v55_v2, %v54_v1  ;;  %v57_v5 = vld [vmem:[#allocation6 + $0x18] sm:$0xff]  ;;  %v52_v6 = vld [vmem:[#allocation3] sm:$0xff]  ;;  %v181_v15 = vld [vmem:[%s367_s2] ss:$0 sm:$0xff]  ;;  %s166_s12 = sshll.u32 %s290_s11, 4  ;;  %s167_s12 = int_to_ptr.vmem [resolvable:$true] %s166_s12 }
  0x29   :  { %v203_v7 = vpack.c.bf16 %v57_v5, %v56_v3  ;;  %196 = vmatprep.mubr.msk.f32.mxu0 %vm58_vm1, %v52_v6  ;;  %v53_v8 = vld [vmem:[#allocation3 + $0x8] sm:$0xff]  ;;  %s257_s13 = scalar_lea.vmem %s167_s12, 256  ;;  %p262_p3 = scmp.lt.s32.totalorder %s167_s12, %s167_s12 }
  0x2a   :  { %200 = vmatprep.subr.bf16.mxu0 %v199_v4  ;;  %p258_p2 = scmp.ne.s32.totalorder %s167_s12, %s257_s13  ;;  %p263_p4 = scmp.lt.s32.totalorder %s257_s13, %s257_s13 }
  0x2b   :  { %202 = vmatpush3.bf16.msra.mxu0 %v199_v4 }
  0x2c   :  { %204 = vmatprep.subr.bf16.mxu0 %v203_v7  ;;  %p264_p5 = por %p263_p4, %p262_p3 }
  0x2e   :  { %v51_v9 = vld [vmem:[#allocation2 + $0x8] sm:$0xff]  ;;  %v50_v10 = vld [vmem:[#allocation2] sm:$0xff]  ;;  %p265_p6 = pnand %p264_p5, %p258_p2 }
  0x2f   :  { %206 = vmatpush3.bf16.msra.mxu0 %v203_v7 }
  0x32   :  { %197 = vmatmul.mubr.msk.f32.vlgmr.msra.gmra.mrb[0].mxu0 %vm58_vm1, %v53_v8 }
 0x105   :  { %v198_v11 = vpop.f32.mrb[0].mxu0 }
 0x106   :  { %v141_v12 = vadd.f32 %v198_v11, %v51_v9  ;;  %v131_v13 = vpop.f32.mrb[1].mxu0 }
 0x107   :  { %v140_v14 = vadd.f32 %v131_v13, %v50_v10 }
 0x108   :  { %144 = vst.msk [vmem:[#allocation2 + $0x8] sm:$0xff] %vm47_vm0, %v141_v12 }
 0x109   :  { %143 = vst.msk [vmem:[#allocation2] sm:$0xff] %vm47_vm0, %v140_v14 }
 0x10f   :  { %v149_v16 = vld [vmem:[#allocation2 + $0x8] sm:$0xff] }
 0x110   :  { %v148_v17 = vld [vmem:[#allocation2] sm:$0xff]  ;;  %v158_v18 = vadd.f32 %v181_v15, %v149_v16 }
 0x111   :  { %v157_v19 = vadd.f32 %v181_v15, %v148_v17 }
 0x112   :  { %160 = vst.msk [vmem:[#allocation8 + $0x8] sm:$0xff] %vm47_vm0, %v158_v18 }
 0x113   :  { %159 = vst.msk [vmem:[#allocation8] sm:$0xff] %vm47_vm0, %v157_v19 }
 0x114   :  { %268 = shalt.err (!%p265_p6)
}
 0x115   :  { %s269_s15 = scalar_lea.hbm %s368_s3, 256 }
 0x116   :  { %p270_p7 = scmp.ne.s32.totalorder %s368_s3, %s269_s15  ;;  %p273_p8 = scmp.lt.u32.totalorder %s269_s15, %s368_s3 }
 0x118   :  { %p275_p9 = pnand %p273_p8, %p270_p7 }
 0x11a   :  { %278 = shalt.err (!%p275_p9)
}
 0x11b   :  { %172 = dma.vmem_to_hbm [thread:$0]  %s167_s12, 256, %s368_s3, [#allocation5], %s286_s22, %s286_s22, %s287_s23  }
 0x11c   :  { %283 = dma.done.wait [#allocation5], 256  }
 0x11d   :  { %284 = vsyncadd [#allocation5], 4294967040 }
 0x11e   :  { %176 = vsyncpa [#allocation4], 1 }
 0x11f   :  { %177 = vsyncpa [#allocation7], 1 }
 0x120   :  { %178 = vsyncpa [#allocation5], 1 }

</bundles_post_ra>
